<compile_context>
chip_gen: v6e
topology: v6e:2x2x1
jax: 0.10.0
libtpu: 0.0.40
codegen_flags: <defaults>
</compile_context>

<pallas_src>
import jax
import jax.numpy as jnp
from jax.experimental import pallas as pl
from jax.experimental.pallas import tpu as pltpu

_LANE = 128


def _round_up(n, m):
    return ((n + m - 1) // m) * m


def _copilot_kernel(x_ref, w1_ref, w_ref, b_ref, o_ref):
    """x_ref : (TILE_B, in_dim) compute dtype  (natural-width activations)
    w1_ref: (in_dim, P)        compute dtype  (fc1 weight, out-padded)
    w_ref : (3, P, P)          compute dtype  (fc2, fc3, fc4^T padded slabs)
    b_ref : (4, 1, P)          float32        (biases, zero-padded)
    o_ref : (TILE_B, 1)        float32        (sigmoid outputs)"""
    cdt = w1_ref.dtype

    # fc1: narrow-K MXU matmul (K = in_dim, no zero-padding of x anywhere).
    z = jnp.dot(x_ref[...], w1_ref[...], preferred_element_type=jnp.float32)
    z = z + b_ref[0]                                       # (1, P) broadcast
    h = jnp.maximum(z, 0.0).astype(cdt)                    # (TILE_B, P)

    # fc2, fc3: full (TILE_B,P)x(P,P) MXU matmuls, f32 bias/ReLU.
    for j in range(2):                                     # static unroll
        z = jnp.dot(h, w_ref[j], preferred_element_type=jnp.float32)
        z = z + b_ref[j + 1]
        h = jnp.maximum(z, 0.0).astype(cdt)

    # fc4 (P -> 1): w4 was packed transposed, so row 0 of slab 2 is the (1, P)
    # weight row. VPU multiply + one lane reduction; no activation transpose.
    w4_row = w_ref[2, 0:1, :].astype(jnp.float32)          # (1, P)
    z4 = jnp.sum(h.astype(jnp.float32) * w4_row, axis=-1, keepdims=True)
    z4 = z4 + b_ref[3, :, 0:1]                             # (1, 1) bias
    o_ref[...] = jax.nn.sigmoid(z4)                        # (TILE_B, 1)


def _pack_params(params, compute_dtype):
    """Pack weights into VMEM-resident slabs.

    Returns:
      w1_p  : (in_dim, P)  fc1 weight, output dim zero-padded to P
      w_slab: (3, P, P)    fc2, fc3, fc4^T, each zero-padded to (P, P)
      b_slab: (4, 1, P)    biases zero-padded to P (f32)
      P     : common padded hidden width (multiple of 128)
    """
    w1, w2, w3, w4 = (params[f"w{i}"] for i in range(1, 5))
    b1, b2, b3, b4 = (params[f"b{i}"].reshape(1, -1) for i in range(1, 5))
    P = _round_up(
        max(w1.shape[1], w2.shape[0], w2.shape[1], w3.shape[0], w3.shape[1],
            w4.shape[0]), _LANE)

    w1_p = jnp.pad(w1, ((0, 0), (0, P - w1.shape[1]))).astype(compute_dtype)

    def pad_pp(w):
        return jnp.pad(w, ((0, P - w.shape[0]), (0, P - w.shape[1])))

    # w4 is packed transposed: slab row 0 holds the (1, h3) weight row.
    w_slab = jnp.stack([pad_pp(w2), pad_pp(w3), pad_pp(w4.T)]).astype(compute_dtype)
    b_slab = jnp.stack([
        jnp.pad(b, ((0, 0), (0, P - b.shape[1]))) for b in (b1, b2, b3, b4)
    ]).astype(jnp.float32)
    return w1_p, w_slab, b_slab, P


def copilot_forward(x, params, *, tile_b=1024, compute_dtype=jnp.bfloat16):
    """x: (B, in_dim) float32. params: w1..w4 as (in, out), b1..b4 as (1, out).
    Returns (B, 1) float32 sigmoid outputs (matches the PyTorch module)."""
    B, in_dim = x.shape
    w1_p, w_slab, b_slab, P = _pack_params(params, compute_dtype)

    # Batch tiling: tile_b a multiple of 128 (clean (8,128) tiling), clamped so
    # the grid has >= 2 tiles whenever the batch allows it (feeds both v7x TCs).
    b_ceil = _round_up(B, _LANE)
    tile_b = min(tile_b, b_ceil)
    if b_ceil >= 2 * _LANE:
        tile_b = min(tile_b, b_ceil // 2)
    tile_b = max(_LANE, (tile_b // _LANE) * _LANE)
    B_pad = _round_up(B, tile_b)
    num_tiles = B_pad // tile_b

    # Only pad the batch dimension (rows > B are junk and sliced off below);
    # the feature dimension stays at its natural width in HBM.
    x_c = x.astype(compute_dtype)
    x_p = x_c if B_pad == B else jnp.pad(x_c, ((0, B_pad - B), (0, 0)))

    out = pl.pallas_call(
        _copilot_kernel,
        out_shape=jax.ShapeDtypeStruct((B_pad, 1), jnp.float32),
        grid=(num_tiles,),
        in_specs=[
            # activations: one batch tile per grid step, natural feature width
            pl.BlockSpec((tile_b, in_dim), lambda i: (i, 0)),
            # weights / biases: constant block index -> fetched once, VMEM-resident
            pl.BlockSpec((in_dim, P), lambda i: (0, 0)),
            pl.BlockSpec((3, P, P), lambda i: (0, 0, 0)),
            pl.BlockSpec((4, 1, P), lambda i: (0, 0, 0)),
        ],
        out_specs=pl.BlockSpec((tile_b, 1), lambda i: (i, 0)),
        compiler_params=pltpu.CompilerParams(
            dimension_semantics=("parallel",)),  # shard batch tiles across TCs (v7x)
    )(x_p, w1_p, w_slab, b_slab)

    return out[:B]


def init_params(key, in_dim, h1, h2, h3):
    """Deterministic init mimicking nn.Linear's U(-1/sqrt(fan_in), 1/sqrt(fan_in))."""
    dims = [(in_dim, h1), (h1, h2), (h2, h3), (h3, 1)]
    params = {}
    for i, (fan_in, fan_out) in enumerate(dims, start=1):
        key, kw, kb = jax.random.split(key, 3)
        bound = 1.0 / jnp.sqrt(float(fan_in))
        params[f"w{i}"] = jax.random.uniform(
            kw, (fan_in, fan_out), jnp.float32, -bound, bound)
        params[f"b{i}"] = jax.random.uniform(
            kb, (1, fan_out), jnp.float32, -bound, bound)
    return params


def _reference_forward(x, params):
    h = jnp.maximum(x @ params["w1"] + params["b1"], 0.0)
    h = jnp.maximum(h @ params["w2"] + params["b2"], 0.0)
    h = jnp.maximum(h @ params["w3"] + params["b3"], 0.0)
    return jax.nn.sigmoid(h @ params["w4"] + params["b4"])


if __name__ == "__main__":
    # LunarLander-ish sizes (obs dim 8, small hidden layers); batch large enough
    # to exercise a multi-tile batch grid (2 tiles of 256 rows).
    B, in_dim, h1, h2, h3 = 512, 8, 64, 64, 32

    key = jax.random.PRNGKey(0)
    key, kx = jax.random.split(key)
    x = jax.random.normal(kx, (B, in_dim), jnp.float32)
    params = init_params(key, in_dim, h1, h2, h3)

    ref = _reference_forward(x, params)

    # f32-operand path: strict check against the module semantics.
    out = copilot_forward(x, params, tile_b=256, compute_dtype=jnp.float32)
    out = jax.block_until_ready(out)
    assert out.shape == (B, 1)
    assert jnp.allclose(out, ref, atol=1e-4, rtol=1e-4)

    # Default path: bf16 MXU operands, f32 accumulate/elementwise (loose check).
    out_bf16 = copilot_forward(x, params)
    out_bf16 = jax.block_until_ready(out_bf16)
    assert out_bf16.shape == (B, 1)
    assert jnp.allclose(out_bf16, ref, atol=5e-2)

    print("KERNEL_OK")
</pallas_src>

<mosaic_0001>
module attributes {stable_mosaic.version = 11 : i64} {
  func.func @_copilot_kernel(%arg0: i32, %arg1: memref<256x8xf32, #tpu.memory_space<vmem>>, %arg2: memref<8x128xf32, #tpu.memory_space<vmem>>, %arg3: memref<3x128x128xf32, #tpu.memory_space<vmem>>, %arg4: memref<4x1x128xf32, #tpu.memory_space<vmem>>, %arg5: memref<256x1xf32, #tpu.memory_space<vmem>>) attributes {dimension_semantics = [#tpu.dimension_semantics<parallel>], iteration_bounds = array<i64: 2>, scalar_prefetch = 0 : i64, scratch_operands = 0 : i64, tpu.core_type = #tpu.core_type<tc>, window_params = [{transform_indices = @transform_0, window_bounds = array<i64: 256, 8>}, {pipeline_mode = #tpu.pipeline_mode<synchronous>, transform_indices = @transform_1, window_bounds = array<i64: 8, 128>}, {pipeline_mode = #tpu.pipeline_mode<synchronous>, transform_indices = @transform_2, window_bounds = array<i64: 3, 128, 128>}, {pipeline_mode = #tpu.pipeline_mode<synchronous>, transform_indices = @transform_3, window_bounds = array<i64: 4, 1, 128>}, {transform_indices = @transform_4, window_bounds = array<i64: 256, 1>}]} {
    %c0 = arith.constant 0 : index
    %c0_0 = arith.constant 0 : index
    %0 = vector.load %arg1[%c0, %c0_0] : memref<256x8xf32, #tpu.memory_space<vmem>>, vector<256x8xf32>
    %c0_1 = arith.constant 0 : index
    %c0_2 = arith.constant 0 : index
    %1 = vector.load %arg2[%c0_1, %c0_2] : memref<8x128xf32, #tpu.memory_space<vmem>>, vector<8x128xf32>
    %cst = arith.constant dense<0.000000e+00> : vector<256x128xf32>
    %2 = tpu.matmul %0, %1, %cst {dimension_numbers = #tpu.dot_dimension_numbers<[1], [0], [0], [1], [0, 0, 1, 1], [], []>} : vector<256x8xf32>, vector<8x128xf32>, vector<256x128xf32> -> vector<256x128xf32>
    %c0_3 = arith.constant 0 : index
    %c0_4 = arith.constant 0 : index
    %c0_5 = arith.constant 0 : index
    %3 = vector.load %arg4[%c0_3, %c0_4, %c0_5] : memref<4x1x128xf32, #tpu.memory_space<vmem>>, vector<1x1x128xf32>
    %4 = vector.shape_cast %3 : vector<1x1x128xf32> to vector<1x128xf32>
    %5 = vector.broadcast %4 : vector<1x128xf32> to vector<256x128xf32>
    %6 = arith.addf %2, %5 : vector<256x128xf32>
    %cst_6 = arith.constant 0.000000e+00 : f32
    %7 = vector.broadcast %cst_6 : f32 to vector<256x128xf32>
    %8 = arith.maximumf %6, %7 : vector<256x128xf32>
    %c0_7 = arith.constant 0 : index
    %c0_8 = arith.constant 0 : index
    %c0_9 = arith.constant 0 : index
    %9 = vector.load %arg3[%c0_7, %c0_8, %c0_9] : memref<3x128x128xf32, #tpu.memory_space<vmem>>, vector<1x128x128xf32>
    %10 = vector.shape_cast %9 : vector<1x128x128xf32> to vector<128x128xf32>
    %cst_10 = arith.constant dense<0.000000e+00> : vector<256x128xf32>
    %11 = tpu.matmul %8, %10, %cst_10 {dimension_numbers = #tpu.dot_dimension_numbers<[1], [0], [0], [1], [0, 0, 1, 1], [], []>} : vector<256x128xf32>, vector<128x128xf32>, vector<256x128xf32> -> vector<256x128xf32>
    %c1 = arith.constant 1 : index
    %c0_11 = arith.constant 0 : index
    %c0_12 = arith.constant 0 : index
    %12 = vector.load %arg4[%c1, %c0_11, %c0_12] : memref<4x1x128xf32, #tpu.memory_space<vmem>>, vector<1x1x128xf32>
    %13 = vector.shape_cast %12 : vector<1x1x128xf32> to vector<1x128xf32>
    %14 = vector.broadcast %13 : vector<1x128xf32> to vector<256x128xf32>
    %15 = arith.addf %11, %14 : vector<256x128xf32>
    %cst_13 = arith.constant 0.000000e+00 : f32
    %16 = vector.broadcast %cst_13 : f32 to vector<256x128xf32>
    %17 = arith.maximumf %15, %16 : vector<256x128xf32>
    %c1_14 = arith.constant 1 : index
    %c0_15 = arith.constant 0 : index
    %c0_16 = arith.constant 0 : index
    %18 = vector.load %arg3[%c1_14, %c0_15, %c0_16] : memref<3x128x128xf32, #tpu.memory_space<vmem>>, vector<1x128x128xf32>
    %19 = vector.shape_cast %18 : vector<1x128x128xf32> to vector<128x128xf32>
    %cst_17 = arith.constant dense<0.000000e+00> : vector<256x128xf32>
    %20 = tpu.matmul %17, %19, %cst_17 {dimension_numbers = #tpu.dot_dimension_numbers<[1], [0], [0], [1], [0, 0, 1, 1], [], []>} : vector<256x128xf32>, vector<128x128xf32>, vector<256x128xf32> -> vector<256x128xf32>
    %c2 = arith.constant 2 : index
    %c0_18 = arith.constant 0 : index
    %c0_19 = arith.constant 0 : index
    %21 = vector.load %arg4[%c2, %c0_18, %c0_19] : memref<4x1x128xf32, #tpu.memory_space<vmem>>, vector<1x1x128xf32>
    %22 = vector.shape_cast %21 : vector<1x1x128xf32> to vector<1x128xf32>
    %23 = vector.broadcast %22 : vector<1x128xf32> to vector<256x128xf32>
    %24 = arith.addf %20, %23 : vector<256x128xf32>
    %cst_20 = arith.constant 0.000000e+00 : f32
    %25 = vector.broadcast %cst_20 : f32 to vector<256x128xf32>
    %26 = arith.maximumf %24, %25 : vector<256x128xf32>
    %c2_21 = arith.constant 2 : index
    %c0_22 = arith.constant 0 : index
    %c0_23 = arith.constant 0 : index
    %27 = vector.load %arg3[%c2_21, %c0_22, %c0_23] : memref<3x128x128xf32, #tpu.memory_space<vmem>>, vector<1x1x128xf32>
    %28 = vector.shape_cast %27 : vector<1x1x128xf32> to vector<1x128xf32>
    %29 = vector.broadcast %28 : vector<1x128xf32> to vector<256x128xf32>
    %30 = arith.mulf %26, %29 : vector<256x128xf32>
    %cst_24 = arith.constant dense<0.000000e+00> : vector<256xf32>
    %31 = vector.multi_reduction <add>, %30, %cst_24 [1] : vector<256x128xf32> to vector<256xf32>
    %32 = vector.shape_cast %31 : vector<256xf32> to vector<256x1xf32>
    %c3 = arith.constant 3 : index
    %c0_25 = arith.constant 0 : index
    %c0_26 = arith.constant 0 : index
    %33 = vector.load %arg4[%c3, %c0_25, %c0_26] : memref<4x1x128xf32, #tpu.memory_space<vmem>>, vector<1x1x1xf32>
    %34 = vector.shape_cast %33 : vector<1x1x1xf32> to vector<1x1xf32>
    %35 = vector.broadcast %34 : vector<1x1xf32> to vector<256x1xf32>
    %36 = arith.addf %32, %35 : vector<256x1xf32>
    %37 = arith.negf %36 : vector<256x1xf32>
    %38 = math.exp %37 : vector<256x1xf32>
    %cst_27 = arith.constant 1.000000e+00 : f32
    %39 = vector.broadcast %cst_27 : f32 to vector<256x1xf32>
    %40 = arith.addf %39, %38 : vector<256x1xf32>
    %41 = arith.divf %39, %40 : vector<256x1xf32>
    %c0_28 = arith.constant 0 : index
    %c0_29 = arith.constant 0 : index
    %42 = vector.load %arg5[%c0_28, %c0_29] : memref<256x1xf32, #tpu.memory_space<vmem>>, vector<256x1xf32>
    tpu.vector_store %arg5[%c0_28, %c0_29], %41 {strides = array<i32>} : memref<256x1xf32, #tpu.memory_space<vmem>>, vector<256x1xf32>,
    return
  }
  func.func @transform_0(%arg0: i32) -> (i32, i32) {
    %c0_i32 = arith.constant 0 : i32
    %c0_i32_0 = arith.constant 0 : i32
    return %arg0, %c0_i32 : i32, i32
  }
  func.func @transform_1(%arg0: i32) -> (i32, i32) {
    %c0_i32 = arith.constant 0 : i32
    %c0_i32_0 = arith.constant 0 : i32
    %c0_i32_1 = arith.constant 0 : i32
    return %c0_i32, %c0_i32_0 : i32, i32
  }
  func.func @transform_2(%arg0: i32) -> (i32, i32, i32) {
    %c0_i32 = arith.constant 0 : i32
    %c0_i32_0 = arith.constant 0 : i32
    %c0_i32_1 = arith.constant 0 : i32
    %c0_i32_2 = arith.constant 0 : i32
    return %c0_i32, %c0_i32_0, %c0_i32_1 : i32, i32, i32
  }
  func.func @transform_3(%arg0: i32) -> (i32, i32, i32) {
    %c0_i32 = arith.constant 0 : i32
    %c0_i32_0 = arith.constant 0 : i32
    %c0_i32_1 = arith.constant 0 : i32
    %c0_i32_2 = arith.constant 0 : i32
    return %c0_i32, %c0_i32_0, %c0_i32_1 : i32, i32, i32
  }
  func.func @transform_4(%arg0: i32) -> (i32, i32) {
    %c0_i32 = arith.constant 0 : i32
    %c0_i32_0 = arith.constant 0 : i32
    return %arg0, %c0_i32 : i32, i32
  }
}

</mosaic_0001>

<bundles_post_ra>
// kernel: tpu_custom_call.1
= control target key start
LH: loop header
LB: loop body
LE: loop exit
PB: predicated region body
PF: predicated region fallthrough
CT: control target
= control target key end

     0   :  { %s2191_s15 = smov 0   ;;  %s2634_s0 = inlined_call_operand.vmem [shape: f32[512,8], index: 0, kind: input, shape index: {}]   ;;  %s2635_s1 = inlined_call_operand.vmem [shape: f32[8,128], index: 1, kind: input, shape index: {}]   ;;  %s2636_s2 = inlined_call_operand.vmem [shape: f32[3,128,128], index: 2, kind: input, shape index: {}]   ;;  %s2637_s3 = inlined_call_operand.vmem [shape: f32[4,1,128], index: 3, kind: input, shape index: {}]   ;;  %s2638_s4 = inlined_call_operand.vmem [shape: f32[512,1], index: 4, kind: output, shape index: {}]  }
   0x1 LB: > { %s1581_s16 = sadd.s32 4294967295, %s2164_s15   ;;  %p1585_p0 = scmp.ge.s32.totalorder %s2164_s15, 1  ;;  %s2164_s15 = sphi %s2191_s15, %s14_s15  }
   0x2   : > { %p163_p1 = scmp.lt.s32.totalorder %s2164_s15, 3 }
   0x4   : > { %p164_p2 = pnand %p1585_p0, %p163_p1 }
   0x5   : > { %s1586_s19 = sshll.u32 (!%p164_p2), %s1581_s16, 5 }
   0x6   : > { %167 = sbr.rel (%p164_p2) target bundleno = 852 (0x354), region = 36  ;;  %p190_p3 = scmp.lt.s32.totalorder (!%p164_p2), %s1586_s19, 63 }
   0xb   : > { %v233_v0 = vld [vmem:[%s2635_s1] sm:$0xff]  ;;  %v610_v1 = vld [vmem:[%s2636_s2 + $0x78] sm:$0xff]  ;;  %s2640_s19 = smov (!%p190_p3, %s1586_s19), 63  ;;  %vm241_vm0 = vcmask 64512   ;;  %v609_v10 = vld [vmem:[%s2636_s2 + $0x70] sm:$0xff]  ;;  %vm1492_vm1 = vcmask 7168  }
   0xc   : > { %1810 = vmatprep.subr.mxu0 %v233_v0  ;;  %2020 = vmatprep.subr.mxu1 %v233_v0  ;;  %s1587_s22 = sshll.u32 %s2640_s19, 3  ;;  %v608_v15 = vld [vmem:[%s2636_s2 + $0x68] sm:$0xff]  ;;  %v607_v17 = vld [vmem:[%s2636_s2 + $0x60] sm:$0xff]  ;;  %v606_v21 = vld [vmem:[%s2636_s2 + $0x58] sm:$0xff] }
   0xd   : > { %1811 = vmatpush3.msra.mxu0 %v233_v0  ;;  %2021 = vmatpush3.msra.mxu1 %v233_v0  ;;  %s2213_s25 = scalar_lea.vmem %s2634_s0, %s1587_s22  ;;  %v605_v26 = vld [vmem:[%s2636_s2 + $0x50] sm:$0xff]  ;;  %v604_v28 = vld [vmem:[%s2636_s2 + $0x48] sm:$0xff]  ;;  %v603_v32 = vld [vmem:[%s2636_s2 + $0x40] sm:$0xff]  ;;  %s2548_s5 = scalar_lea.vmem %s2638_s4, %s1587_s22 }
   0xe   : > { %1860 = vmatprep.subr.mxu1 %v610_v1  ;;  %v201_v2 = vld [vmem:[%s2213_s25] sm:$0xff]  ;;  %v202_v3 = vld [vmem:[%s2213_s25 + $0x8] sm:$0xff]  ;;  %v203_v4 = vld [vmem:[%s2213_s25 + $0x10] sm:$0xff] }
   0xf   : > { %1812 = vmatprep.mubr.msk.f32.mxu0 %vm241_vm0, %v201_v2  ;;  %v204_v5 = vld [vmem:[%s2213_s25 + $0x18] sm:$0xff]  ;;  %v205_v6 = vld [vmem:[%s2213_s25 + $0x20] sm:$0xff]  ;;  %v218_v8 = vld [vmem:[%s2213_s25 + $0x88] sm:$0xff] }
  0x10   : > { %1813 = vmatmul.mubr.msk.f32.vlgmr.msra.gmra.mxu0 %vm241_vm0, %v202_v3  ;;  %v217_v7 = vld [vmem:[%s2213_s25 + $0x80] sm:$0xff]  ;;  %v219_v9 = vld [vmem:[%s2213_s25 + $0x90] sm:$0xff]  ;;  %v206_v11 = vld [vmem:[%s2213_s25 + $0x28] sm:$0xff] }
  0x11   : > { %1815 = vmatprep.mubr.msk.f32.mxu0 %vm241_vm0, %v203_v4  ;;  %1836 = vmatprep.mubr.msk.f32.mxu1 %vm241_vm0, %v217_v7  ;;  %v207_v12 = vld [vmem:[%s2213_s25 + $0x30] sm:$0xff]  ;;  %v220_v13 = vld [vmem:[%s2213_s25 + $0x98] sm:$0xff]  ;;  %v221_v14 = vld [vmem:[%s2213_s25 + $0xa0] sm:$0xff] }
  0x12   : > { %1837 = vmatmul.mubr.msk.f32.vlgmr.msra.gmra.mxu1 %vm241_vm0, %v218_v8  ;;  %v208_v16 = vld [vmem:[%s2213_s25 + $0x38] sm:$0xff]  ;;  %v209_v18 = vld [vmem:[%s2213_s25 + $0x40] sm:$0xff]  ;;  %v222_v19 = vld [vmem:[%s2213_s25 + $0xa8] sm:$0xff] }
  0x13   : > { %1839 = vmatprep.mubr.msk.f32.mxu1 %vm241_vm0, %v219_v9  ;;  %1861 = vmatpush3.msra.mxu1 %v610_v1  ;;  %v223_v20 = vld [vmem:[%s2213_s25 + $0xb0] sm:$0xff]  ;;  %v210_v22 = vld [vmem:[%s2213_s25 + $0x48] sm:$0xff]  ;;  %v224_v24 = vld [vmem:[%s2213_s25 + $0xb8] sm:$0xff] }
  0x14   : > { %1816 = vmatmul.mubr.msk.f32.gmra.mxu0 %vm241_vm0, %v204_v5  ;;  %1862 = vmatprep.subr.mxu1 %v609_v10  ;;  %v211_v23 = vld [vmem:[%s2213_s25 + $0x50] sm:$0xff]  ;;  %v225_v25 = vld [vmem:[%s2213_s25 + $0xc0] sm:$0xff]  ;;  %v212_v27 = vld [vmem:[%s2213_s25 + $0x58] sm:$0xff] }
  0x15   : > { %1818 = vmatprep.mubr.msk.f32.mxu0 %vm241_vm0, %v205_v6  ;;  %1863 = vmatpush3.msra.mxu1 %v609_v10  ;;  %v213_v29 = vld [vmem:[%s2213_s25 + $0x60] sm:$0xff]  ;;  %v226_v30 = vld [vmem:[%s2213_s25 + $0xc8] sm:$0xff]  ;;  %v227_v31 = vld [vmem:[%s2213_s25 + $0xd0] sm:$0xff] }
  0x16   : > { %1840 = vmatmul.mubr.msk.f32.gmra.mxu1 %vm241_vm0, %v220_v13  ;;  %1864 = vmatprep.subr.mxu1 %v608_v15  ;;  %v214_v33 = vld [vmem:[%s2213_s25 + $0x68] sm:$0xff]  ;;  %v215_v34 = vld [vmem:[%s2213_s25 + $0x70] sm:$0xff]  ;;  %v228_v35 = vld [vmem:[%s2213_s25 + $0xd8] sm:$0xff] }
  0x17   : > { %1842 = vmatprep.mubr.msk.f32.mxu1 %vm241_vm0, %v221_v14  ;;  %1865 = vmatpush3.msra.mxu1 %v608_v15  ;;  %v229_v36 = vld [vmem:[%s2213_s25 + $0xe0] sm:$0xff]  ;;  %v602_v37 = vld [vmem:[%s2636_s2 + $0x38] sm:$0xff]  ;;  %v601_v39 = vld [vmem:[%s2636_s2 + $0x30] sm:$0xff] }
  0x18   : > { %1819 = vmatmul.mubr.msk.f32.gmra.mxu0 %vm241_vm0, %v206_v11  ;;  %1866 = vmatprep.subr.mxu1 %v607_v17  ;;  %v216_v38 = vld [vmem:[%s2213_s25 + $0x78] sm:$0xff]  ;;  %v230_v40 = vld [vmem:[%s2213_s25 + $0xe8] sm:$0xff]  ;;  %v231_v41 = vld [vmem:[%s2213_s25 + $0xf0] sm:$0xff] }
  0x19   : > { %1821 = vmatprep.mubr.msk.f32.mxu0 %vm241_vm0, %v207_v12  ;;  %1867 = vmatpush3.msra.mxu1 %v607_v17  ;;  %v600_v42 = vld [vmem:[%s2636_s2 + $0x28] sm:$0xff]  ;;  %v232_v43 = vld [vmem:[%s2213_s25 + $0xf8] sm:$0xff]  ;;  %v599_v44 = vld [vmem:[%s2636_s2 + $0x20] sm:$0xff] }
  0x1a   : > { %1843 = vmatmul.mubr.msk.f32.gmra.mxu1 %vm241_vm0, %v222_v19  ;;  %1868 = vmatprep.subr.mxu1 %v606_v21  ;;  %v598_v45 = vld [vmem:[%s2636_s2 + $0x18] sm:$0xff]  ;;  %v597_v46 = vld [vmem:[%s2636_s2 + $0x10] sm:$0xff]  ;;  %v596_v47 = vld [vmem:[%s2636_s2 + $0x8] sm:$0xff] }
  0x1b   : > { %1845 = vmatprep.mubr.msk.f32.mxu1 %vm241_vm0, %v223_v20  ;;  %1869 = vmatpush3.msra.mxu1 %v606_v21  ;;  %v595_v48 = vld [vmem:[%s2636_s2] sm:$0xff]  ;;  %v1640_v49 = vld [vmem:[%s2636_s2 + $0xf8] sm:$0xff]  ;;  %v1639_v50 = vld [vmem:[%s2636_s2 + $0xf0] sm:$0xff] }
  0x1c   : > { %1822 = vmatmul.mubr.msk.f32.gmra.mxu0 %vm241_vm0, %v208_v16  ;;  %1870 = vmatprep.subr.mxu1 %v605_v26  ;;  %v1638_v51 = vld [vmem:[%s2636_s2 + $0xe8] sm:$0xff]  ;;  %v1637_v52 = vld [vmem:[%s2636_s2 + $0xe0] sm:$0xff]  ;;  %v1636_v53 = vld [vmem:[%s2636_s2 + $0xd8] sm:$0xff] }
  0x1d   : > { %1824 = vmatprep.mubr.msk.f32.mxu0 %vm241_vm0, %v209_v18  ;;  %1871 = vmatpush3.msra.mxu1 %v605_v26  ;;  %v1635_v54 = vld [vmem:[%s2636_s2 + $0xd0] sm:$0xff]  ;;  %v1634_v55 = vld [vmem:[%s2636_s2 + $0xc8] sm:$0xff]  ;;  %v1633_v56 = vld [vmem:[%s2636_s2 + $0xc0] sm:$0xff] }
  0x1e   : > { %1846 = vmatmul.mubr.msk.f32.gmra.mxu1 %vm241_vm0, %v224_v24  ;;  %1872 = vmatprep.subr.mxu1 %v604_v28  ;;  %v1632_v57 = vld [vmem:[%s2636_s2 + $0xb8] sm:$0xff]  ;;  %v1631_v58 = vld [vmem:[%s2636_s2 + $0xb0] sm:$0xff]  ;;  %v1630_v59 = vld [vmem:[%s2636_s2 + $0xa8] sm:$0xff] }
  0x1f   : > { %1848 = vmatprep.mubr.msk.f32.mxu1 %vm241_vm0, %v225_v25  ;;  %1873 = vmatpush3.msra.mxu1 %v604_v28  ;;  %v1629_v60 = vld [vmem:[%s2636_s2 + $0xa0] sm:$0xff]  ;;  %v1628_v61 = vld [vmem:[%s2636_s2 + $0x98] sm:$0xff] }
  0x20   : > { %1825 = vmatmul.mubr.msk.f32.gmra.mxu0 %vm241_vm0, %v210_v22  ;;  %1874 = vmatprep.subr.mxu1 %v603_v32  ;;  %v2366_v62 = vld [vmem:[%s2637_s3] ss:$0 sm:$0xff] }
  0x21   : > { %1827 = vmatprep.mubr.msk.f32.mxu0 %vm241_vm0, %v211_v23  ;;  %1875 = vmatpush3.msra.mxu1 %v603_v32 }
  0x22   : > { %1849 = vmatmul.mubr.msk.f32.gmra.mxu1 %vm241_vm0, %v226_v30  ;;  %1876 = vmatprep.subr.mxu1 %v602_v37 }
  0x23   : > { %1851 = vmatprep.mubr.msk.f32.mxu1 %vm241_vm0, %v227_v31  ;;  %1877 = vmatpush3.msra.mxu1 %v602_v37 }
  0x24   : > { %1828 = vmatmul.mubr.msk.f32.gmra.mxu0 %vm241_vm0, %v212_v27  ;;  %1878 = vmatprep.subr.mxu1 %v601_v39 }
  0x25   : > { %1830 = vmatprep.mubr.msk.f32.mxu0 %vm241_vm0, %v213_v29  ;;  %1879 = vmatpush3.msra.mxu1 %v601_v39 }
  0x26   : > { %1852 = vmatmul.mubr.msk.f32.gmra.mxu1 %vm241_vm0, %v228_v35  ;;  %1880 = vmatprep.subr.mxu1 %v600_v42 }
  0x27   : > { %1854 = vmatprep.mubr.msk.f32.mxu1 %vm241_vm0, %v229_v36  ;;  %1881 = vmatpush3.msra.mxu1 %v600_v42 }
  0x28   : > { %1831 = vmatmul.mubr.msk.f32.gmra.mxu0 %vm241_vm0, %v214_v33  ;;  %1882 = vmatprep.subr.mxu1 %v599_v44 }
  0x29   : > { %1833 = vmatprep.mubr.msk.f32.mxu0 %vm241_vm0, %v215_v34  ;;  %1883 = vmatpush3.msra.mxu1 %v599_v44 }
  0x2a   : > { %1855 = vmatmul.mubr.msk.f32.gmra.mxu1 %vm241_vm0, %v230_v40  ;;  %1884 = vmatprep.subr.mxu1 %v598_v45 }
  0x2b   : > { %1857 = vmatprep.mubr.msk.f32.mxu1 %vm241_vm0, %v231_v41  ;;  %1885 = vmatpush3.msra.mxu1 %v598_v45 }
  0x2c   : > { %1834 = vmatmul.mubr.msk.f32.gmra.mxu0 %vm241_vm0, %v216_v38  ;;  %1886 = vmatprep.subr.mxu1 %v597_v46 }
  0x2d   : > { %1887 = vmatpush3.msra.mxu1 %v597_v46  ;;  %1940 = vmatprep.subr.mxu0 %v1640_v49 }
  0x2e   : > { %1858 = vmatmul.mubr.msk.f32.gmra.mxu1 %vm241_vm0, %v232_v43  ;;  %1888 = vmatprep.subr.mxu1 %v596_v47 }
  0x2f   : > { %1889 = vmatpush3.msra.mxu1 %v596_v47  ;;  %1941 = vmatpush3.msra.mxu0 %v1640_v49 }
  0x30   : > { %1890 = vmatprep.subr.mxu1 %v595_v48  ;;  %1942 = vmatprep.subr.mxu0 %v1639_v50 }
  0x31   : > { %1891 = vmatpush3.msra.mxu1 %v595_v48  ;;  %1943 = vmatpush3.msra.mxu0 %v1639_v50 }
  0x32   : > { %1944 = vmatprep.subr.mxu0 %v1638_v51 }
  0x33   : > { %1945 = vmatpush3.msra.mxu0 %v1638_v51 }
  0x34   : > { %1946 = vmatprep.subr.mxu0 %v1637_v52 }
  0x35   : > { %1947 = vmatpush3.msra.mxu0 %v1637_v52 }
  0x36   : > { %1948 = vmatprep.subr.mxu0 %v1636_v53 }
  0x37   : > { %1949 = vmatpush3.msra.mxu0 %v1636_v53 }
  0x38   : > { %1950 = vmatprep.subr.mxu0 %v1635_v54 }
  0x39   : > { %1951 = vmatpush3.msra.mxu0 %v1635_v54 }
  0x3a   : > { %1952 = vmatprep.subr.mxu0 %v1634_v55 }
  0x3b   : > { %1953 = vmatpush3.msra.mxu0 %v1634_v55 }
  0x3c   : > { %1954 = vmatprep.subr.mxu0 %v1633_v56 }
  0x3d   : > { %1955 = vmatpush3.msra.mxu0 %v1633_v56 }
  0x3e   : > { %1956 = vmatprep.subr.mxu0 %v1632_v57 }
  0x3f   : > { %1957 = vmatpush3.msra.mxu0 %v1632_v57 }
  0x40   : > { %1958 = vmatprep.subr.mxu0 %v1631_v58 }
  0x41   : > { %1959 = vmatpush3.msra.mxu0 %v1631_v58 }
  0x42   : > { %1960 = vmatprep.subr.mxu0 %v1630_v59 }
  0x43   : > { %1961 = vmatpush3.msra.mxu0 %v1630_v59 }
  0x44   : > { %1962 = vmatprep.subr.mxu0 %v1629_v60 }
  0x45   : > { %1963 = vmatpush3.msra.mxu0 %v1629_v60 }
  0x46   : > { %1964 = vmatprep.subr.mxu0 %v1628_v61 }
  0x47   : > { %1965 = vmatpush3.msra.mxu0 %v1628_v61 }
  0xd0   : > { %v1814_v63 = vpop.f32.mrf.mxu0 }
  0xd1   : > { %v410_v0 = vadd.f32 %v1814_v63, %v2366_v62 }
  0xd2   : > { %v404_v1 = vpop.f32.mrf.mxu0  ;;  %v2370_v5 = vpop.f32.mrf.mxu1 }
  0xd3   : > { %v405_v2 = vadd.f32 %v2366_v62, %v404_v1  ;;  %v564_v6 = vmax.f32 %v410_v0, 0.0  ;;  %v490_v57 = vadd.f32 %v2370_v5, %v2366_v62 }
  0xd4   : > { %v1817_v3 = vpop.f32.mrf.mxu0  ;;  %v484_v10 = vpop.f32.mrf.mxu1 }
  0xd5   : > { %v563_v4 = vmax.f32 %v405_v2, 0.0  ;;  %v420_v7 = vadd.f32 %v1817_v3, %v2366_v62  ;;  %v485_v52 = vadd.f32 %v2366_v62, %v484_v10  ;;  %v580_v63 = vmax.f32 %v490_v57, 0.0 }
  0xd6   : > { %v414_v8 = vpop.f32.mrf.mxu0  ;;  %v1841_v14 = vpop.f32.mrf.mxu1 }
  0xd7   : > { %v415_v9 = vadd.f32 %v2366_v62, %v414_v8  ;;  %1892 = vmatprep.mubr.f32.mxu1 %v563_v4  ;;  %v566_v15 = vmax.f32 %v420_v7, 0.0  ;;  %v579_v59 = vmax.f32 %v485_v52, 0.0  ;;  %v500_v0 = vadd.f32 %v1841_v14, %v2366_v62 }
  0xd8   : > { %v1820_v11 = vpop.f32.mrf.mxu0  ;;  %1893 = vmatmul.mubr.f32.vlgmr.msra.gmra.mxu1 %v564_v6  ;;  %v494_v18 = vpop.f32.mrf.mxu1 }
  0xd9   : > { %v565_v12 = vmax.f32 %v415_v9, 0.0  ;;  %v430_v13 = vadd.f32 %v1820_v11, %v2366_v62  ;;  %v495_v60 = vadd.f32 %v2366_v62, %v494_v18  ;;  %v582_v4 = vmax.f32 %v500_v0, 0.0 }
  0xda   : > { %v424_v16 = vpop.f32.mrf.mxu0  ;;  %v1844_v23 = vpop.f32.mrf.mxu1 }
  0xdb   : > { %v425_v17 = vadd.f32 %v2366_v62, %v424_v16  ;;  %1895 = vmatprep.mubr.f32.mxu1 %v565_v12  ;;  %v568_v19 = vmax.f32 %v430_v13, 0.0  ;;  %v581_v1 = vmax.f32 %v495_v60, 0.0  ;;  %v510_v6 = vadd.f32 %v1844_v23, %v2366_v62 }
  0xdc   : > { %v1823_v20 = vpop.f32.mrf.mxu0  ;;  %1896 = vmatmul.mubr.f32.gmra.mxu1 %v566_v15  ;;  %v504_v26 = vpop.f32.mrf.mxu1 }
  0xdd   : > { %v567_v21 = vmax.f32 %v425_v17, 0.0  ;;  %v440_v22 = vadd.f32 %v1823_v20, %v2366_v62  ;;  %v505_v2 = vadd.f32 %v2366_v62, %v504_v26  ;;  %v584_v9 = vmax.f32 %v510_v6, 0.0 }
  0xde   : > { %v434_v24 = vpop.f32.mrf.mxu0  ;;  %v1847_v32 = vpop.f32.mrf.mxu1 }
  0xdf   : > { %v435_v25 = vadd.f32 %v2366_v62, %v434_v24  ;;  %1898 = vmatprep.mubr.f32.mxu1 %v567_v21  ;;  %v570_v27 = vmax.f32 %v440_v22, 0.0  ;;  %v583_v5 = vmax.f32 %v505_v2, 0.0  ;;  %v520_v10 = vadd.f32 %v1847_v32, %v2366_v62  ;;  %v1627_v32 = vld [vmem:[%s2636_s2 + $0x90] sm:$0xff] }
  0xe0   : > { %v1826_v28 = vpop.f32.mrf.mxu0  ;;  %1899 = vmatmul.mubr.f32.gmra.mxu1 %v568_v19  ;;  %v514_v39 = vpop.f32.mrf.mxu1  ;;  %1966 = vmatprep.subr.mxu0 %v1627_v32 }
  0xe1   : > { %v569_v29 = vmax.f32 %v435_v25, 0.0  ;;  %v450_v30 = vadd.f32 %v1826_v28, %v2366_v62  ;;  %v515_v7 = vadd.f32 %v2366_v62, %v514_v39  ;;  %v586_v14 = vmax.f32 %v520_v10, 0.0  ;;  %1967 = vmatpush3.msra.mxu0 %v1627_v32 }
  0xe2   : > { %v444_v31 = vpop.f32.mrf.mxu0  ;;  %v1850_v46 = vpop.f32.mrf.mxu1 }
  0xe3   : > { %v445_v33 = vadd.f32 %v2366_v62, %v444_v31  ;;  %1901 = vmatprep.mubr.f32.mxu1 %v569_v29  ;;  %v572_v34 = vmax.f32 %v450_v30, 0.0  ;;  %v585_v11 = vmax.f32 %v515_v7, 0.0  ;;  %v530_v15 = vadd.f32 %v1850_v46, %v2366_v62 }
  0xe4   : > { %v1829_v35 = vpop.f32.mrf.mxu0  ;;  %1902 = vmatmul.mubr.f32.gmra.mxu1 %v570_v27  ;;  %v524_v54 = vpop.f32.mrf.mxu1 }
  0xe5   : > { %v571_v36 = vmax.f32 %v445_v33, 0.0  ;;  %v460_v37 = vadd.f32 %v1829_v35, %v2366_v62  ;;  %v525_v12 = vadd.f32 %v2366_v62, %v524_v54  ;;  %v588_v19 = vmax.f32 %v530_v15, 0.0  ;;  %v1626_v33 = vld [vmem:[%s2636_s2 + $0x88] sm:$0xff] }
  0xe6   : > { %v454_v38 = vpop.f32.mrf.mxu0  ;;  %v1853_v61 = vpop.f32.mrf.mxu1  ;;  %1968 = vmatprep.subr.mxu0 %v1626_v33 }
  0xe7   : > { %v455_v40 = vadd.f32 %v2366_v62, %v454_v38  ;;  %1904 = vmatprep.mubr.f32.mxu1 %v571_v36  ;;  %v574_v41 = vmax.f32 %v460_v37, 0.0  ;;  %v587_v16 = vmax.f32 %v525_v12, 0.0  ;;  %v540_v20 = vadd.f32 %v1853_v61, %v2366_v62  ;;  %1969 = vmatpush3.msra.mxu0 %v1626_v33 }
  0xe8   : > { %v1832_v42 = vpop.f32.mrf.mxu0  ;;  %1905 = vmatmul.mubr.f32.gmra.mxu1 %v572_v34  ;;  %v534_v3 = vpop.f32.mrf.mxu1  ;;  %v2415_v34 = vld [vmem:[%s2637_s3 + $0x1] ss:$0 sm:$0xff] }
  0xe9   : > { %v573_v43 = vmax.f32 %v455_v40, 0.0  ;;  %v470_v44 = vadd.f32 %v1832_v42, %v2366_v62  ;;  %v535_v17 = vadd.f32 %v2366_v62, %v534_v3  ;;  %v590_v24 = vmax.f32 %v540_v20, 0.0 }
  0xea   : > { %v464_v45 = vpop.f32.mrf.mxu0  ;;  %v1856_v8 = vpop.f32.mrf.mxu1 }
  0xeb   : > { %v465_v47 = vadd.f32 %v2366_v62, %v464_v45  ;;  %1907 = vmatprep.mubr.f32.mxu1 %v573_v43  ;;  %v576_v48 = vmax.f32 %v470_v44, 0.0  ;;  %v589_v21 = vmax.f32 %v535_v17, 0.0  ;;  %v550_v25 = vadd.f32 %v1856_v8, %v2366_v62 }
  0xec   : > { %v1835_v49 = vpop.f32.mrf.mxu0  ;;  %1908 = vmatmul.mubr.f32.gmra.mxu1 %v574_v41  ;;  %v544_v13 = vpop.f32.mrf.mxu1 }
  0xed   : > { %v575_v50 = vmax.f32 %v465_v47, 0.0  ;;  %v480_v51 = vadd.f32 %v1835_v49, %v2366_v62  ;;  %v545_v22 = vadd.f32 %v2366_v62, %v544_v13  ;;  %v592_v28 = vmax.f32 %v550_v25, 0.0 }
  0xee   : > { %v474_v53 = vpop.f32.mrf.mxu0  ;;  %v1859_v18 = vpop.f32.mrf.mxu1 }
  0xef   : > { %v475_v55 = vadd.f32 %v2366_v62, %v474_v53  ;;  %1910 = vmatprep.mubr.f32.mxu1 %v575_v50  ;;  %v578_v56 = vmax.f32 %v480_v51, 0.0  ;;  %v591_v26 = vmax.f32 %v545_v22, 0.0  ;;  %v560_v29 = vadd.f32 %v1859_v18, %v2366_v62 }
  0xf0   : > { %1911 = vmatmul.mubr.f32.gmra.mxu1 %v576_v48  ;;  %v554_v23 = vpop.f32.mrf.mxu1 }
  0xf1   : > { %v577_v58 = vmax.f32 %v475_v55, 0.0  ;;  %v555_v27 = vadd.f32 %v2366_v62, %v554_v23  ;;  %v594_v31 = vmax.f32 %v560_v29, 0.0  ;;  %v1625_v62 = vld [vmem:[%s2636_s2 + $0x80] sm:$0xff] }
  0xf2   : > { %1970 = vmatprep.subr.mxu0 %v1625_v62 }
  0xf3   : > { %1913 = vmatprep.mubr.f32.mxu1 %v577_v58  ;;  %v593_v30 = vmax.f32 %v555_v27, 0.0  ;;  %1971 = vmatpush3.msra.mxu0 %v1625_v62 }
  0xf4   : > { %1914 = vmatmul.mubr.f32.gmra.mxu1 %v578_v56 }
  0xf5   : > { %1916 = vmatprep.mubr.f32.mxu1 %v579_v59 }
  0xf8   : > { %1917 = vmatmul.mubr.f32.gmra.mxu1 %v580_v63 }
  0xf9   : > { %1919 = vmatprep.mubr.f32.mxu1 %v581_v1 }
  0xfc   : > { %1920 = vmatmul.mubr.f32.gmra.mxu1 %v582_v4 }
  0xfd   : > { %1922 = vmatprep.mubr.f32.mxu1 %v583_v5 }
 0x100   : > { %1923 = vmatmul.mubr.f32.gmra.mxu1 %v584_v9 }
 0x101   : > { %1925 = vmatprep.mubr.f32.mxu1 %v585_v11 }
 0x104   : > { %1926 = vmatmul.mubr.f32.gmra.mxu1 %v586_v14 }
 0x105   : > { %1928 = vmatprep.mubr.f32.mxu1 %v587_v16 }
 0x108   : > { %1929 = vmatmul.mubr.f32.gmra.mxu1 %v588_v19 }
 0x109   : > { %1931 = vmatprep.mubr.f32.mxu1 %v589_v21 }
 0x10c   : > { %1932 = vmatmul.mubr.f32.gmra.mxu1 %v590_v24 }
 0x10d   : > { %1934 = vmatprep.mubr.f32.mxu1 %v591_v26 }
 0x110   : > { %1935 = vmatmul.mubr.f32.gmra.mxu1 %v592_v28 }
 0x111   : > { %1937 = vmatprep.mubr.f32.mxu1 %v593_v30 }
 0x114   : > { %1938 = vmatmul.mubr.f32.gmra.mxu1 %v594_v31 }
 0x198   : > { %v1894_v35 = vpop.f32.mrf.mxu1 }
 0x199   : > { %v691_v36 = vadd.f32 %v1894_v35, %v2415_v34 }
 0x19a   : > { %v685_v37 = vpop.f32.mrf.mxu1 }
 0x19b   : > { %v686_v38 = vadd.f32 %v2415_v34, %v685_v37  ;;  %v845_v41 = vmax.f32 %v691_v36, 0.0 }
 0x19c   : > { %v1897_v39 = vpop.f32.mrf.mxu1 }
 0x19d   : > { %v844_v40 = vmax.f32 %v686_v38, 0.0  ;;  %v701_v42 = vadd.f32 %v1897_v39, %v2415_v34 }
 0x19e   : > { %v695_v43 = vpop.f32.mrf.mxu1 }
 0x19f   : > { %v696_v44 = vadd.f32 %v2415_v34, %v695_v43  ;;  %1972 = vmatprep.mubr.f32.mxu0 %v844_v40  ;;  %v847_v47 = vmax.f32 %v701_v42, 0.0 }
 0x1a0   : > { %v1900_v45 = vpop.f32.mrf.mxu1  ;;  %1973 = vmatmul.mubr.f32.vlgmr.msra.gmra.mxu0 %v845_v41 }
 0x1a1   : > { %v846_v46 = vmax.f32 %v696_v44, 0.0  ;;  %v711_v48 = vadd.f32 %v1900_v45, %v2415_v34 }
 0x1a2   : > { %v705_v49 = vpop.f32.mrf.mxu1 }
 0x1a3   : > { %v706_v50 = vadd.f32 %v2415_v34, %v705_v49  ;;  %1975 = vmatprep.mubr.f32.mxu0 %v846_v46  ;;  %v849_v53 = vmax.f32 %v711_v48, 0.0 }
 0x1a4   : > { %v1903_v51 = vpop.f32.mrf.mxu1  ;;  %1976 = vmatmul.mubr.f32.gmra.mxu0 %v847_v47 }
 0x1a5   : > { %v848_v52 = vmax.f32 %v706_v50, 0.0  ;;  %v721_v54 = vadd.f32 %v1903_v51, %v2415_v34 }
 0x1a6   : > { %v715_v55 = vpop.f32.mrf.mxu1 }
 0x1a7   : > { %v716_v56 = vadd.f32 %v2415_v34, %v715_v55  ;;  %1978 = vmatprep.mubr.f32.mxu0 %v848_v52  ;;  %v851_v59 = vmax.f32 %v721_v54, 0.0 }
 0x1a8   : > { %v1906_v57 = vpop.f32.mrf.mxu1  ;;  %1979 = vmatmul.mubr.f32.gmra.mxu0 %v849_v53 }
 0x1a9   : > { %v850_v58 = vmax.f32 %v716_v56, 0.0  ;;  %v731_v60 = vadd.f32 %v1906_v57, %v2415_v34 }
 0x1aa   : > { %v725_v61 = vpop.f32.mrf.mxu1 }
 0x1ab   : > { %v726_v63 = vadd.f32 %v2415_v34, %v725_v61  ;;  %1981 = vmatprep.mubr.f32.mxu0 %v850_v58  ;;  %v853_v2 = vmax.f32 %v731_v60, 0.0 }
 0x1ac   : > { %v1909_v0 = vpop.f32.mrf.mxu1  ;;  %1982 = vmatmul.mubr.f32.gmra.mxu0 %v851_v59 }
 0x1ad   : > { %v852_v1 = vmax.f32 %v726_v63, 0.0  ;;  %v741_v3 = vadd.f32 %v1909_v0, %v2415_v34 }
 0x1ae   : > { %v735_v4 = vpop.f32.mrf.mxu1 }
 0x1af   : > { %v736_v6 = vadd.f32 %v2415_v34, %v735_v4  ;;  %1984 = vmatprep.mubr.f32.mxu0 %v852_v1  ;;  %v855_v8 = vmax.f32 %v741_v3, 0.0 }
 0x1b0   : > { %v1912_v5 = vpop.f32.mrf.mxu1  ;;  %1985 = vmatmul.mubr.f32.gmra.mxu0 %v853_v2 }
 0x1b1   : > { %v854_v7 = vmax.f32 %v736_v6, 0.0  ;;  %v751_v9 = vadd.f32 %v1912_v5, %v2415_v34  ;;  %v2452_v6 = vld [vmem:[%s2637_s3 + $0x2] ss:$0 sm:$0xff] }
 0x1b2   : > { %v745_v10 = vpop.f32.mrf.mxu1 }
 0x1b3   : > { %v746_v11 = vadd.f32 %v2415_v34, %v745_v10  ;;  %1987 = vmatprep.mubr.f32.mxu0 %v854_v7  ;;  %v857_v14 = vmax.f32 %v751_v9, 0.0  ;;  %v2458_v9 = vld [vmem:[%s2636_s2 + $0x100] ss:$0 sm:$0xff] }
 0x1b4   : > { %v1915_v12 = vpop.f32.mrf.mxu1  ;;  %1988 = vmatmul.mubr.f32.gmra.mxu0 %v855_v8 }
 0x1b5   : > { %v856_v13 = vmax.f32 %v746_v11, 0.0  ;;  %v761_v15 = vadd.f32 %v1915_v12, %v2415_v34 }
 0x1b6   : > { %v755_v16 = vpop.f32.mrf.mxu1 }
 0x1b7   : > { %v756_v17 = vadd.f32 %v2415_v34, %v755_v16  ;;  %1990 = vmatprep.mubr.f32.mxu0 %v856_v13  ;;  %v859_v20 = vmax.f32 %v761_v15, 0.0 }
 0x1b8   : > { %v1918_v18 = vpop.f32.mrf.mxu1  ;;  %1991 = vmatmul.mubr.f32.gmra.mxu0 %v857_v14 }
 0x1b9   : > { %v858_v19 = vmax.f32 %v756_v17, 0.0  ;;  %v771_v21 = vadd.f32 %v1918_v18, %v2415_v34 }
 0x1ba   : > { %v765_v22 = vpop.f32.mrf.mxu1 }
 0x1bb   : > { %v766_v23 = vadd.f32 %v2415_v34, %v765_v22  ;;  %1993 = vmatprep.mubr.f32.mxu0 %v858_v19  ;;  %v861_v26 = vmax.f32 %v771_v21, 0.0 }
 0x1bc   : > { %v1921_v24 = vpop.f32.mrf.mxu1  ;;  %1994 = vmatmul.mubr.f32.gmra.mxu0 %v859_v20 }
 0x1bd   : > { %v860_v25 = vmax.f32 %v766_v23, 0.0  ;;  %v781_v27 = vadd.f32 %v1921_v24, %v2415_v34 }
 0x1be   : > { %v775_v28 = vpop.f32.mrf.mxu1 }
 0x1bf   : > { %v776_v29 = vadd.f32 %v2415_v34, %v775_v28  ;;  %1996 = vmatprep.mubr.f32.mxu0 %v860_v25  ;;  %v863_v32 = vmax.f32 %v781_v27, 0.0 }
 0x1c0   : > { %v1924_v30 = vpop.f32.mrf.mxu1  ;;  %1997 = vmatmul.mubr.f32.gmra.mxu0 %v861_v26 }
 0x1c1   : > { %v862_v31 = vmax.f32 %v776_v29, 0.0  ;;  %v791_v33 = vadd.f32 %v1924_v30, %v2415_v34 }
 0x1c2   : > { %v785_v62 = vpop.f32.mrf.mxu1 }
 0x1c3   : > { %v786_v35 = vadd.f32 %v2415_v34, %v785_v62  ;;  %1999 = vmatprep.mubr.f32.mxu0 %v862_v31  ;;  %v865_v38 = vmax.f32 %v791_v33, 0.0 }
 0x1c4   : > { %v1927_v36 = vpop.f32.mrf.mxu1  ;;  %2000 = vmatmul.mubr.f32.gmra.mxu0 %v863_v32 }
 0x1c5   : > { %v864_v37 = vmax.f32 %v786_v35, 0.0  ;;  %v801_v39 = vadd.f32 %v1927_v36, %v2415_v34 }
 0x1c6   : > { %v795_v40 = vpop.f32.mrf.mxu1 }
 0x1c7   : > { %v796_v41 = vadd.f32 %v2415_v34, %v795_v40  ;;  %2002 = vmatprep.mubr.f32.mxu0 %v864_v37  ;;  %v867_v44 = vmax.f32 %v801_v39, 0.0 }
 0x1c8   : > { %v1930_v42 = vpop.f32.mrf.mxu1  ;;  %2003 = vmatmul.mubr.f32.gmra.mxu0 %v865_v38 }
 0x1c9   : > { %v866_v43 = vmax.f32 %v796_v41, 0.0  ;;  %v811_v45 = vadd.f32 %v1930_v42, %v2415_v34 }
 0x1ca   : > { %v805_v46 = vpop.f32.mrf.mxu1 }
 0x1cb   : > { %v806_v47 = vadd.f32 %v2415_v34, %v805_v46  ;;  %2005 = vmatprep.mubr.f32.mxu0 %v866_v43  ;;  %v869_v50 = vmax.f32 %v811_v45, 0.0 }
 0x1cc   : > { %v1933_v48 = vpop.f32.mrf.mxu1  ;;  %2006 = vmatmul.mubr.f32.gmra.mxu0 %v867_v44 }
 0x1cd   : > { %v868_v49 = vmax.f32 %v806_v47, 0.0  ;;  %v821_v51 = vadd.f32 %v1933_v48, %v2415_v34 }
 0x1ce   : > { %v815_v52 = vpop.f32.mrf.mxu1 }
 0x1cf   : > { %v816_v53 = vadd.f32 %v2415_v34, %v815_v52  ;;  %2008 = vmatprep.mubr.f32.mxu0 %v868_v49  ;;  %v871_v56 = vmax.f32 %v821_v51, 0.0 }
 0x1d0   : > { %v1936_v54 = vpop.f32.mrf.mxu1  ;;  %2009 = vmatmul.mubr.f32.gmra.mxu0 %v869_v50 }
 0x1d1   : > { %v870_v55 = vmax.f32 %v816_v53, 0.0  ;;  %v831_v57 = vadd.f32 %v1936_v54, %v2415_v34 }
 0x1d2   : > { %v825_v58 = vpop.f32.mrf.mxu1 }
 0x1d3   : > { %v826_v59 = vadd.f32 %v2415_v34, %v825_v58  ;;  %2011 = vmatprep.mubr.f32.mxu0 %v870_v55  ;;  %v873_v63 = vmax.f32 %v831_v57, 0.0 }
 0x1d4   : > { %v1939_v60 = vpop.f32.mrf.mxu1  ;;  %2012 = vmatmul.mubr.f32.gmra.mxu0 %v871_v56 }
 0x1d5   : > { %v872_v61 = vmax.f32 %v826_v59, 0.0  ;;  %v841_v0 = vadd.f32 %v1939_v60, %v2415_v34 }
 0x1d6   : > { %v835_v1 = vpop.f32.mrf.mxu1 }
 0x1d7   : > { %v836_v2 = vadd.f32 %v2415_v34, %v835_v1  ;;  %2014 = vmatprep.mubr.f32.mxu0 %v872_v61  ;;  %v875_v4 = vmax.f32 %v841_v0, 0.0 }
 0x1d8   : > { %2015 = vmatmul.mubr.f32.gmra.mxu0 %v873_v63 }
 0x1d9   : > { %v874_v3 = vmax.f32 %v836_v2, 0.0 }
 0x1db   : > { %2017 = vmatprep.mubr.f32.mxu0 %v874_v3 }
 0x1dc   : > { %2018 = vmatmul.mubr.f32.gmra.mxu0 %v875_v4 }
 0x260   : > { %v1974_v5 = vpop.f32.mrf.mxu0 }
 0x261   : > { %v973_v7 = vadd.f32 %v1974_v5, %v2452_v6 }
 0x262   : > { %v967_v8 = vpop.f32.mrf.mxu0 }
 0x263   : > { %v1127_v34 = vmax.f32 %v973_v7, 0.0  ;;  %v968_v10 = vadd.f32 %v2452_v6, %v967_v8 }
 0x264   : > { %v1977_v11 = vpop.f32.mrf.mxu0 }
 0x265   : > { %v1126_v12 = vmax.f32 %v968_v10, 0.0  ;;  %v983_v13 = vadd.f32 %v1977_v11, %v2452_v6  ;;  %v1165_v14 = vmul.f32 %v2458_v9, %v1127_v34 }
 0x266   : > { %v977_v15 = vpop.f32.mrf.mxu0 }
 0x267   : > { %v1129_v16 = vmax.f32 %v983_v13, 0.0  ;;  %v978_v17 = vadd.f32 %v2452_v6, %v977_v15  ;;  %1198 = vadd.xlane.f32.xlu0 %v1165_v14  ;;  %v1164_v22 = vmul.f32 %v2458_v9, %v1126_v12 }
 0x268   : > { %v1980_v18 = vpop.f32.mrf.mxu0 }
 0x269   : > { %v1128_v19 = vmax.f32 %v978_v17, 0.0  ;;  %v993_v20 = vadd.f32 %v1980_v18, %v2452_v6  ;;  %v1167_v21 = vmul.f32 %v2458_v9, %v1129_v16 }
 0x26a   : > { %v987_v23 = vpop.f32.mrf.mxu0 }
 0x26b   : > { %v988_v24 = vadd.f32 %v2452_v6, %v987_v23  ;;  %1202 = vadd.xlane.f32.xlu1 %v1167_v21  ;;  %1196 = vadd.xlane.f32.xlu0 %v1164_v22  ;;  %v1131_v26 = vmax.f32 %v993_v20, 0.0  ;;  %v1166_v29 = vmul.f32 %v2458_v9, %v1128_v19 }
 0x26c   : > { %v1983_v25 = vpop.f32.mrf.mxu0 }
 0x26d   : > { %v1130_v27 = vmax.f32 %v988_v24, 0.0  ;;  %v1003_v28 = vadd.f32 %v1983_v25, %v2452_v6  ;;  %v1169_v37 = vmul.f32 %v2458_v9, %v1131_v26 }
 0x26e   : > { %v997_v30 = vpop.f32.mrf.mxu0 }
 0x26f   : > { %v998_v31 = vadd.f32 %v2452_v6, %v997_v30  ;;  %1200 = vadd.xlane.f32.xlu1 %v1166_v29  ;;  %v1168_v32 = vmul.f32 %v2458_v9, %v1130_v27  ;;  %v1133_v62 = vmax.f32 %v1003_v28, 0.0 }
 0x270   : > { %v1986_v33 = vpop.f32.mrf.mxu0 }
 0x271   : > { %v1132_v35 = vmax.f32 %v998_v31, 0.0  ;;  %v1013_v36 = vadd.f32 %v1986_v33, %v2452_v6  ;;  %1204 = vadd.xlane.f32.xlu0 %v1168_v32  ;;  %v1171_v45 = vmul.f32 %v2458_v9, %v1133_v62 }
 0x272   : > { %v1007_v38 = vpop.f32.mrf.mxu0 }
 0x273   : > { %v1008_v39 = vadd.f32 %v2452_v6, %v1007_v38  ;;  %1206 = vadd.xlane.f32.xlu1 %v1169_v37  ;;  %v1170_v40 = vmul.f32 %v2458_v9, %v1132_v35  ;;  %v1135_v42 = vmax.f32 %v1013_v36, 0.0 }
 0x274   : > { %v1989_v41 = vpop.f32.mrf.mxu0 }
 0x275   : > { %v1134_v43 = vmax.f32 %v1008_v39, 0.0  ;;  %v1023_v44 = vadd.f32 %v1989_v41, %v2452_v6  ;;  %1208 = vadd.xlane.f32.xlu0 %v1170_v40  ;;  %v1173_v53 = vmul.f32 %v2458_v9, %v1135_v42 }
 0x276   : > { %v1017_v46 = vpop.f32.mrf.mxu0 }
 0x277   : > { %v1018_v47 = vadd.f32 %v2452_v6, %v1017_v46  ;;  %1210 = vadd.xlane.f32.xlu1 %v1171_v45  ;;  %v1172_v48 = vmul.f32 %v2458_v9, %v1134_v43  ;;  %v1137_v50 = vmax.f32 %v1023_v44, 0.0 }
 0x278   : > { %v1992_v49 = vpop.f32.mrf.mxu0 }
 0x279   : > { %v1136_v51 = vmax.f32 %v1018_v47, 0.0  ;;  %v1033_v52 = vadd.f32 %v1992_v49, %v2452_v6  ;;  %1212 = vadd.xlane.f32.xlu0 %v1172_v48  ;;  %v1175_v61 = vmul.f32 %v2458_v9, %v1137_v50 }
 0x27a   : > { %v1027_v54 = vpop.f32.mrf.mxu0 }
 0x27b   : > { %v1028_v55 = vadd.f32 %v2452_v6, %v1027_v54  ;;  %1214 = vadd.xlane.f32.xlu1 %v1173_v53  ;;  %v1174_v56 = vmul.f32 %v2458_v9, %v1136_v51  ;;  %v1139_v58 = vmax.f32 %v1033_v52, 0.0 }
 0x27c   : > { %v1995_v57 = vpop.f32.mrf.mxu0 }
 0x27d   : > { %v1138_v59 = vmax.f32 %v1028_v55, 0.0  ;;  %v1043_v60 = vadd.f32 %v1995_v57, %v2452_v6  ;;  %1216 = vadd.xlane.f32.xlu0 %v1174_v56  ;;  %v1177_v7 = vmul.f32 %v2458_v9, %v1139_v58 }
 0x27e   : > { %v1037_v63 = vpop.f32.mrf.mxu0 }
 0x27f   : > { %v1038_v0 = vadd.f32 %v2452_v6, %v1037_v63  ;;  %1218 = vadd.xlane.f32.xlu1 %v1175_v61  ;;  %v1176_v1 = vmul.f32 %v2458_v9, %v1138_v59  ;;  %v1141_v3 = vmax.f32 %v1043_v60, 0.0 }
 0x280   : > { %v1998_v2 = vpop.f32.mrf.mxu0 }
 0x281   : > { %v1140_v4 = vmax.f32 %v1038_v0, 0.0  ;;  %v1053_v5 = vadd.f32 %v1998_v2, %v2452_v6  ;;  %1220 = vadd.xlane.f32.xlu0 %v1176_v1  ;;  %v1179_v15 = vmul.f32 %v2458_v9, %v1141_v3 }
 0x282   : > { %v1047_v8 = vpop.f32.mrf.mxu0 }
 0x283   : > { %v1048_v34 = vadd.f32 %v2452_v6, %v1047_v8  ;;  %1222 = vadd.xlane.f32.xlu1 %v1177_v7  ;;  %v1178_v10 = vmul.f32 %v2458_v9, %v1140_v4  ;;  %v1143_v12 = vmax.f32 %v1053_v5, 0.0 }
 0x284   : > { %v2001_v11 = vpop.f32.mrf.mxu0 }
 0x285   : > { %v1142_v13 = vmax.f32 %v1048_v34, 0.0  ;;  %v1063_v14 = vadd.f32 %v2001_v11, %v2452_v6  ;;  %1224 = vadd.xlane.f32.xlu0 %v1178_v10  ;;  %v1181_v23 = vmul.f32 %v2458_v9, %v1143_v12  ;;  %v2526_v10 = vld [vmem:[%s2637_s3 + $0x3] ss:$0 sm:$0xff] }
 0x286   : > { %v1057_v16 = vpop.f32.mrf.mxu0 }
 0x287   : > { %v1058_v17 = vadd.f32 %v2452_v6, %v1057_v16  ;;  %1226 = vadd.xlane.f32.xlu1 %v1179_v15  ;;  %v1180_v18 = vmul.f32 %v2458_v9, %v1142_v13  ;;  %v1145_v20 = vmax.f32 %v1063_v14, 0.0 }
 0x288   : > { %v2004_v19 = vpop.f32.mrf.mxu0 }
 0x289   : > { %v1144_v21 = vmax.f32 %v1058_v17, 0.0  ;;  %v1073_v22 = vadd.f32 %v2004_v19, %v2452_v6  ;;  %1228 = vadd.xlane.f32.xlu0 %v1180_v18  ;;  %v1183_v31 = vmul.f32 %v2458_v9, %v1145_v20 }
 0x28a   : > { %v1067_v24 = vpop.f32.mrf.mxu0 }
 0x28b   : > { %v1068_v25 = vadd.f32 %v2452_v6, %v1067_v24  ;;  %1230 = vadd.xlane.f32.xlu1 %v1181_v23  ;;  %v1182_v26 = vmul.f32 %v2458_v9, %v1144_v21  ;;  %v1147_v28 = vmax.f32 %v1073_v22, 0.0 }
 0x28c   : > { %v2007_v27 = vpop.f32.mrf.mxu0 }
 0x28d   : > { %v1146_v29 = vmax.f32 %v1068_v25, 0.0  ;;  %v1083_v30 = vadd.f32 %v2007_v27, %v2452_v6  ;;  %1232 = vadd.xlane.f32.xlu0 %v1182_v26  ;;  %v1185_v39 = vmul.f32 %v2458_v9, %v1147_v28 }
 0x28e   : > { %v1077_v32 = vpop.f32.mrf.mxu0 }
 0x28f   : > { %v1078_v33 = vadd.f32 %v2452_v6, %v1077_v32  ;;  %1234 = vadd.xlane.f32.xlu1 %v1183_v31  ;;  %v1184_v62 = vmul.f32 %v2458_v9, %v1146_v29  ;;  %v1149_v36 = vmax.f32 %v1083_v30, 0.0 }
 0x290   : > { %v2010_v35 = vpop.f32.mrf.mxu0 }
 0x291   : > { %v1148_v37 = vmax.f32 %v1078_v33, 0.0  ;;  %v1093_v38 = vadd.f32 %v2010_v35, %v2452_v6  ;;  %1236 = vadd.xlane.f32.xlu0 %v1184_v62  ;;  %v1187_v47 = vmul.f32 %v2458_v9, %v1149_v36 }
 0x292   : > { %v1087_v40 = vpop.f32.mrf.mxu0 }
 0x293   : > { %v1088_v41 = vadd.f32 %v2452_v6, %v1087_v40  ;;  %1238 = vadd.xlane.f32.xlu1 %v1185_v39  ;;  %v1186_v42 = vmul.f32 %v2458_v9, %v1148_v37  ;;  %v1151_v44 = vmax.f32 %v1093_v38, 0.0 }
 0x294   : > { %v2013_v43 = vpop.f32.mrf.mxu0 }
 0x295   : > { %v1150_v45 = vmax.f32 %v1088_v41, 0.0  ;;  %v1103_v46 = vadd.f32 %v2013_v43, %v2452_v6  ;;  %1240 = vadd.xlane.f32.xlu0 %v1186_v42  ;;  %v1189_v55 = vmul.f32 %v2458_v9, %v1151_v44 }
 0x296   : > { %v1097_v48 = vpop.f32.mrf.mxu0 }
 0x297   : > { %v1098_v49 = vadd.f32 %v2452_v6, %v1097_v48  ;;  %1242 = vadd.xlane.f32.xlu1 %v1187_v47  ;;  %v1188_v50 = vmul.f32 %v2458_v9, %v1150_v45  ;;  %v1153_v52 = vmax.f32 %v1103_v46, 0.0 }
 0x298   : > { %v2016_v51 = vpop.f32.mrf.mxu0 }
 0x299   : > { %v1152_v53 = vmax.f32 %v1098_v49, 0.0  ;;  %v1113_v54 = vadd.f32 %v2016_v51, %v2452_v6  ;;  %1244 = vadd.xlane.f32.xlu0 %v1188_v50  ;;  %v1191_v0 = vmul.f32 %v2458_v9, %v1153_v52 }
 0x29a   : > { %v1107_v56 = vpop.f32.mrf.mxu0 }
 0x29b   : > { %v1108_v57 = vadd.f32 %v2452_v6, %v1107_v56  ;;  %1246 = vadd.xlane.f32.xlu1 %v1189_v55  ;;  %v1190_v58 = vmul.f32 %v2458_v9, %v1152_v53  ;;  %v1155_v60 = vmax.f32 %v1113_v54, 0.0 }
 0x29c   : > { %v2019_v59 = vpop.f32.mrf.mxu0 }
 0x29d   : > { %v1154_v61 = vmax.f32 %v1108_v57, 0.0  ;;  %v1123_v63 = vadd.f32 %v2019_v59, %v2452_v6  ;;  %1248 = vadd.xlane.f32.xlu0 %v1190_v58  ;;  %v1193_v7 = vmul.f32 %v2458_v9, %v1155_v60 }
 0x29e   : > { %v1117_v1 = vpop.f32.mrf.mxu0 }
 0x29f   : > { %v1157_v2 = vmax.f32 %v1123_v63, 0.0  ;;  %v1118_v3 = vadd.f32 %v2452_v6, %v1117_v1  ;;  %1250 = vadd.xlane.f32.xlu1 %v1191_v0  ;;  %v1192_v4 = vmul.f32 %v2458_v9, %v1154_v61 }
 0x2a1   : > { %v1156_v5 = vmax.f32 %v1118_v3, 0.0  ;;  %1252 = vadd.xlane.f32.xlu0 %v1192_v4  ;;  %v1195_v8 = vmul.f32 %v2458_v9, %v1157_v2 }
 0x2a3   : > { %1254 = vadd.xlane.f32.xlu1 %v1193_v7  ;;  %v1194_v34 = vmul.f32 %v2458_v9, %v1156_v5 }
 0x2a5   : > { %1256 = vadd.xlane.f32.xlu0 %v1194_v34 }
 0x2a7   : > { %1258 = vadd.xlane.f32.xlu1 %v1195_v8 }
 0x2f0   : > { %v1199_v6 = vpop.xlane.xlu0 %1198 }
 0x2f1   : > { %v1269_v11 = vadd.f32 %v2526_v10, %v1199_v6 }
 0x2f3   : > { %v1648_v12 = vmul.f32 -1.442695, %v1269_v11 }
 0x2f4   : > { %v1203_v13 = vpop.xlane.xlu1 %1202  ;;  %v1197_v14 = vpop.xlane.xlu0 %1196 }
 0x2f5   : > { %2030 = vpow2.f32 %v1648_v12  ;;  %v1271_v15 = vadd.f32 %v2526_v10, %v1203_v13  ;;  %v1268_v16 = vadd.f32 %v2526_v10, %v1197_v14 }
 0x2f7   : > { %v1650_v17 = vmul.f32 -1.442695, %v1271_v15  ;;  %v1647_v9 = vmul.f32 -1.442695, %v1268_v16 }
 0x2f8   : > { %v1201_v18 = vpop.xlane.xlu1 %1200 }
 0x2f9   : > { %2032 = vpow2.f32 %v1650_v17  ;;  %v1270_v19 = vadd.f32 %v2526_v10, %v1201_v18 }
 0x2fa   : > { %2034 = vpow2.f32 %v1647_v9  ;;  %v1205_v20 = vpop.xlane.xlu0 %1204 }
 0x2fb   : > { %v1649_v21 = vmul.f32 -1.442695, %v1270_v19  ;;  %v1272_v22 = vadd.f32 %v2526_v10, %v1205_v20 }
 0x2fc   : > { %v1207_v23 = vpop.xlane.xlu1 %1206 }
 0x2fd   : > { %2036 = vpow2.f32 %v1649_v21  ;;  %v1651_v24 = vmul.f32 -1.442695, %v1272_v22  ;;  %v1273_v25 = vadd.f32 %v2526_v10, %v1207_v23 }
 0x2fe   : > { %v1209_v26 = vpop.xlane.xlu0 %1208 }
 0x2ff   : > { %2038 = vpow2.f32 %v1651_v24  ;;  %v1652_v27 = vmul.f32 -1.442695, %v1273_v25  ;;  %v1274_v28 = vadd.f32 %v2526_v10, %v1209_v26 }
 0x300   : > { %v1211_v29 = vpop.xlane.xlu1 %1210 }
 0x301   : > { %2040 = vpow2.f32 %v1652_v27  ;;  %v1653_v30 = vmul.f32 -1.442695, %v1274_v28  ;;  %v1275_v31 = vadd.f32 %v2526_v10, %v1211_v29 }
 0x302   : > { %v2031_v32 = vpop.eup %2030  ;;  %v1213_v33 = vpop.xlane.xlu0 %1212 }
 0x303   : > { %v1397_v62 = vadd.f32 1.0, %v2031_v32  ;;  %2042 = vpow2.f32 %v1653_v30  ;;  %v1654_v35 = vmul.f32 -1.442695, %v1275_v31  ;;  %v1276_v36 = vadd.f32 %v2526_v10, %v1213_v33 }
 0x304   : > { %v1215_v37 = vpop.xlane.xlu1 %1214 }
 0x305   : > { %2044 = vrcp.f32 %v1397_v62  ;;  %v1655_v38 = vmul.f32 -1.442695, %v1276_v36  ;;  %v1277_v39 = vadd.f32 %v2526_v10, %v1215_v37 }
 0x306   : > { %v2033_v40 = vpop.eup %2032  ;;  %2046 = vpow2.f32 %v1654_v35  ;;  %v1217_v41 = vpop.xlane.xlu0 %1216 }
 0x307   : > { %v2035_v42 = vpop.eup %2034  ;;  %v1399_v43 = vadd.f32 1.0, %v2033_v40  ;;  %2048 = vpow2.f32 %v1655_v38  ;;  %v1656_v44 = vmul.f32 -1.442695, %v1277_v39  ;;  %v1278_v45 = vadd.f32 %v2526_v10, %v1217_v41 }
 0x308   : > { %v1396_v46 = vadd.f32 1.0, %v2035_v42  ;;  %v1219_v47 = vpop.xlane.xlu1 %1218 }
 0x309   : > { %2050 = vrcp.f32 %v1399_v43  ;;  %v1657_v48 = vmul.f32 -1.442695, %v1278_v45  ;;  %v1279_v49 = vadd.f32 %v2526_v10, %v1219_v47 }
 0x30a   : > { %v2037_v50 = vpop.eup %2036  ;;  %2052 = vrcp.f32 %v1396_v46  ;;  %v1221_v51 = vpop.xlane.xlu0 %1220 }
 0x30b   : > { %v1398_v52 = vadd.f32 1.0, %v2037_v50  ;;  %2054 = vpow2.f32 %v1656_v44  ;;  %v1658_v53 = vmul.f32 -1.442695, %v1279_v49  ;;  %v1280_v54 = vadd.f32 %v2526_v10, %v1221_v51 }
 0x30c   : > { %v2039_v55 = vpop.eup %2038  ;;  %2056 = vpow2.f32 %v1657_v48  ;;  %v1223_v56 = vpop.xlane.xlu1 %1222 }
 0x30d   : > { %2058 = vrcp.f32 %v1398_v52  ;;  %v1400_v57 = vadd.f32 1.0, %v2039_v55  ;;  %v1659_v58 = vmul.f32 -1.442695, %v1280_v54  ;;  %v1281_v59 = vadd.f32 %v2526_v10, %v1223_v56 }
 0x30e   : > { %v2041_v60 = vpop.eup %2040  ;;  %2060 = vpow2.f32 %v1658_v53  ;;  %v1225_v61 = vpop.xlane.xlu0 %1224 }
 0x30f   : > { %2062 = vrcp.f32 %v1400_v57  ;;  %v1401_v63 = vadd.f32 1.0, %v2041_v60  ;;  %v1660_v0 = vmul.f32 -1.442695, %v1281_v59  ;;  %v1282_v1 = vadd.f32 %v2526_v10, %v1225_v61 }
 0x310   : > { %v2043_v2 = vpop.eup %2042  ;;  %2064 = vpow2.f32 %v1659_v58  ;;  %v1227_v3 = vpop.xlane.xlu1 %1226 }
 0x311   : > { %2066 = vrcp.f32 %v1401_v63  ;;  %v1402_v4 = vadd.f32 1.0, %v2043_v2  ;;  %v1661_v5 = vmul.f32 -1.442695, %v1282_v1  ;;  %v1283_v7 = vadd.f32 %v2526_v10, %v1227_v3 }
 0x312   : > { %v2045_v8 = vpop.eup %2044  ;;  %2068 = vpow2.f32 %v1660_v0  ;;  %v1229_v34 = vpop.xlane.xlu0 %1228 }
 0x313   : > { %v2047_v6 = vpop.eup %2046  ;;  %1494 = vst.msk [vmem:[%s2548_s5 + $0x8] sm:$0xff] %vm1492_vm1, %v2045_v8  ;;  %2070 = vrcp.f32 %v1402_v4  ;;  %v1662_v11 = vmul.f32 -1.442695, %v1283_v7  ;;  %v1284_v12 = vadd.f32 %v2526_v10, %v1229_v34 }
 0x314   : > { %v2049_v13 = vpop.eup %2048  ;;  %v1403_v14 = vadd.f32 1.0, %v2047_v6  ;;  %2072 = vpow2.f32 %v1661_v5  ;;  %v1231_v15 = vpop.xlane.xlu1 %1230 }
 0x315   : > { %v1404_v16 = vadd.f32 1.0, %v2049_v13  ;;  %2074 = vpow2.f32 %v1662_v11  ;;  %v1663_v17 = vmul.f32 -1.442695, %v1284_v12  ;;  %v1285_v9 = vadd.f32 %v2526_v10, %v1231_v15 }
 0x316   : > { %v2051_v18 = vpop.eup %2050  ;;  %2076 = vrcp.f32 %v1403_v14  ;;  %v1233_v19 = vpop.xlane.xlu0 %1232 }
 0x317   : > { %v2053_v20 = vpop.eup %2052  ;;  %1496 = vst.msk [vmem:[%s2548_s5 + $0x18] sm:$0xff] %vm1492_vm1, %v2051_v18  ;;  %2078 = vrcp.f32 %v1404_v16  ;;  %v1664_v21 = vmul.f32 -1.442695, %v1285_v9  ;;  %v1286_v22 = vadd.f32 %v2526_v10, %v1233_v19 }
 0x318   : > { %v2055_v23 = vpop.eup %2054  ;;  %1493 = vst.msk [vmem:[%s2548_s5] sm:$0xff] %vm1492_vm1, %v2053_v20  ;;  %2080 = vpow2.f32 %v1663_v17  ;;  %v1235_v24 = vpop.xlane.xlu1 %1234 }
 0x319   : > { %v2057_v25 = vpop.eup %2056  ;;  %v1405_v26 = vadd.f32 1.0, %v2055_v23  ;;  %2082 = vpow2.f32 %v1664_v21  ;;  %v1665_v27 = vmul.f32 -1.442695, %v1286_v22  ;;  %v1287_v28 = vadd.f32 %v2526_v10, %v1235_v24 }
 0x31a   : > { %v2059_v29 = vpop.eup %2058  ;;  %v1406_v30 = vadd.f32 1.0, %v2057_v25  ;;  %v1237_v31 = vpop.xlane.xlu0 %1236 }
 0x31b   : > { %v2061_v32 = vpop.eup %2060  ;;  %1495 = vst.msk [vmem:[%s2548_s5 + $0x10] sm:$0xff] %vm1492_vm1, %v2059_v29  ;;  %2084 = vrcp.f32 %v1405_v26  ;;  %v1666_v33 = vmul.f32 -1.442695, %v1287_v28  ;;  %v1288_v62 = vadd.f32 %v2526_v10, %v1237_v31 }
 0x31c   : > { %v2063_v35 = vpop.eup %2062  ;;  %2086 = vrcp.f32 %v1406_v30  ;;  %v1407_v36 = vadd.f32 1.0, %v2061_v32  ;;  %v1239_v37 = vpop.xlane.xlu1 %1238 }
 0x31d   : > { %v2065_v38 = vpop.eup %2064  ;;  %1497 = vst.msk [vmem:[%s2548_s5 + $0x20] sm:$0xff] %vm1492_vm1, %v2063_v35  ;;  %2088 = vpow2.f32 %v1665_v27  ;;  %v1667_v39 = vmul.f32 -1.442695, %v1288_v62  ;;  %v1289_v40 = vadd.f32 %v2526_v10, %v1239_v37 }
 0x31e   : > { %v2067_v41 = vpop.eup %2066  ;;  %2090 = vrcp.f32 %v1407_v36  ;;  %v1408_v42 = vadd.f32 1.0, %v2065_v38  ;;  %v1241_v43 = vpop.xlane.xlu0 %1240 }
 0x31f   : > { %v2069_v44 = vpop.eup %2068  ;;  %1498 = vst.msk [vmem:[%s2548_s5 + $0x28] sm:$0xff] %vm1492_vm1, %v2067_v41  ;;  %2092 = vpow2.f32 %v1666_v33  ;;  %v1668_v45 = vmul.f32 -1.442695, %v1289_v40  ;;  %v1290_v46 = vadd.f32 %v2526_v10, %v1241_v43 }
 0x320   : > { %v2071_v47 = vpop.eup %2070  ;;  %2094 = vrcp.f32 %v1408_v42  ;;  %v1409_v48 = vadd.f32 1.0, %v2069_v44  ;;  %v1243_v49 = vpop.xlane.xlu1 %1242 }
 0x321   : > { %v2073_v50 = vpop.eup %2072  ;;  %1499 = vst.msk [vmem:[%s2548_s5 + $0x30] sm:$0xff] %vm1492_vm1, %v2071_v47  ;;  %2096 = vpow2.f32 %v1667_v39  ;;  %v1291_v51 = vadd.f32 %v2526_v10, %v1243_v49  ;;  %v1669_v54 = vmul.f32 -1.442695, %v1290_v46 }
 0x322   : > { %v2075_v52 = vpop.eup %2074  ;;  %2098 = vrcp.f32 %v1409_v48  ;;  %v1410_v53 = vadd.f32 1.0, %v2073_v50  ;;  %v1245_v55 = vpop.xlane.xlu0 %1244 }
 0x323   : > { %v2077_v56 = vpop.eup %2076  ;;  %v1411_v57 = vadd.f32 1.0, %v2075_v52  ;;  %2100 = vpow2.f32 %v1668_v45  ;;  %v1670_v58 = vmul.f32 -1.442695, %v1291_v51  ;;  %v1292_v59 = vadd.f32 %v2526_v10, %v1245_v55 }
 0x324   : > { %v2079_v60 = vpop.eup %2078  ;;  %1500 = vst.msk [vmem:[%s2548_s5 + $0x38] sm:$0xff] %vm1492_vm1, %v2077_v56  ;;  %2102 = vrcp.f32 %v1410_v53  ;;  %v1247_v61 = vpop.xlane.xlu1 %1246 }
 0x325   : > { %v2081_v63 = vpop.eup %2080  ;;  %1501 = vst.msk [vmem:[%s2548_s5 + $0x40] sm:$0xff] %vm1492_vm1, %v2079_v60  ;;  %2104 = vrcp.f32 %v1411_v57  ;;  %v1293_v0 = vadd.f32 %v2526_v10, %v1247_v61  ;;  %v1671_v3 = vmul.f32 -1.442695, %v1292_v59 }
 0x326   : > { %v2083_v1 = vpop.eup %2082  ;;  %v1412_v2 = vadd.f32 1.0, %v2081_v63  ;;  %2106 = vpow2.f32 %v1669_v54  ;;  %v1249_v4 = vpop.xlane.xlu0 %1248 }
 0x327   : > { %v1413_v5 = vadd.f32 1.0, %v2083_v1  ;;  %2108 = vpow2.f32 %v1670_v58  ;;  %v1672_v7 = vmul.f32 -1.442695, %v1293_v0  ;;  %v1294_v8 = vadd.f32 %v2526_v10, %v1249_v4 }
 0x328   : > { %v2085_v34 = vpop.eup %2084  ;;  %2110 = vrcp.f32 %v1412_v2  ;;  %v1251_v6 = vpop.xlane.xlu1 %1250 }
 0x329   : > { %v2087_v11 = vpop.eup %2086  ;;  %1502 = vst.msk [vmem:[%s2548_s5 + $0x48] sm:$0xff] %vm1492_vm1, %v2085_v34  ;;  %2112 = vrcp.f32 %v1413_v5  ;;  %v1673_v12 = vmul.f32 -1.442695, %v1294_v8  ;;  %v1295_v13 = vadd.f32 %v2526_v10, %v1251_v6 }
 0x32a   : > { %v2089_v14 = vpop.eup %2088  ;;  %1503 = vst.msk [vmem:[%s2548_s5 + $0x50] sm:$0xff] %vm1492_vm1, %v2087_v11  ;;  %2114 = vpow2.f32 %v1671_v3  ;;  %v1253_v15 = vpop.xlane.xlu0 %1252 }
 0x32b   : > { %v2091_v16 = vpop.eup %2090  ;;  %v1414_v17 = vadd.f32 1.0, %v2089_v14  ;;  %2116 = vpow2.f32 %v1672_v7  ;;  %v1674_v9 = vmul.f32 -1.442695, %v1295_v13  ;;  %v1296_v18 = vadd.f32 %v2526_v10, %v1253_v15 }
 0x32c   : > { %v2093_v19 = vpop.eup %2092  ;;  %1504 = vst.msk [vmem:[%s2548_s5 + $0x58] sm:$0xff] %vm1492_vm1, %v2091_v16  ;;  %2118 = vpow2.f32 %v1673_v12  ;;  %v1255_v20 = vpop.xlane.xlu1 %1254 }
 0x32d   : > { %v2095_v21 = vpop.eup %2094  ;;  %2120 = vrcp.f32 %v1414_v17  ;;  %v1415_v22 = vadd.f32 1.0, %v2093_v19  ;;  %v1675_v23 = vmul.f32 -1.442695, %v1296_v18  ;;  %v1297_v24 = vadd.f32 %v2526_v10, %v1255_v20 }
 0x32e   : > { %v2097_v25 = vpop.eup %2096  ;;  %1505 = vst.msk [vmem:[%s2548_s5 + $0x60] sm:$0xff] %vm1492_vm1, %v2095_v21  ;;  %2122 = vpow2.f32 %v1674_v9  ;;  %v1257_v26 = vpop.xlane.xlu0 %1256 }
 0x32f   : > { %v2099_v27 = vpop.eup %2098  ;;  %2124 = vrcp.f32 %v1415_v22  ;;  %v1416_v28 = vadd.f32 1.0, %v2097_v25  ;;  %v1676_v29 = vmul.f32 -1.442695, %v1297_v24  ;;  %v1298_v30 = vadd.f32 %v2526_v10, %v1257_v26 }
 0x330   : > { %v2101_v31 = vpop.eup %2100  ;;  %1506 = vst.msk [vmem:[%s2548_s5 + $0x68] sm:$0xff] %vm1492_vm1, %v2099_v27  ;;  %2126 = vpow2.f32 %v1675_v23  ;;  %v1259_v32 = vpop.xlane.xlu1 %1258 }
 0x331   : > { %v2103_v33 = vpop.eup %2102  ;;  %2128 = vrcp.f32 %v1416_v28  ;;  %v1417_v62 = vadd.f32 1.0, %v2101_v31  ;;  %v1677_v35 = vmul.f32 -1.442695, %v1298_v30  ;;  %v1299_v36 = vadd.f32 %v2526_v10, %v1259_v32 }
 0x332   : > { %v2105_v37 = vpop.eup %2104  ;;  %1507 = vst.msk [vmem:[%s2548_s5 + $0x70] sm:$0xff] %vm1492_vm1, %v2103_v33  ;;  %2130 = vpow2.f32 %v1676_v29 }
 0x333   : > { %v2107_v38 = vpop.eup %2106  ;;  %1508 = vst.msk [vmem:[%s2548_s5 + $0x78] sm:$0xff] %vm1492_vm1, %v2105_v37  ;;  %2132 = vrcp.f32 %v1417_v62  ;;  %v1678_v39 = vmul.f32 -1.442695, %v1299_v36 }
 0x334   : > { %v2109_v40 = vpop.eup %2108  ;;  %v1418_v41 = vadd.f32 1.0, %v2107_v38  ;;  %2134 = vpow2.f32 %v1677_v35 }
 0x335   : > { %v2111_v42 = vpop.eup %2110  ;;  %v1419_v43 = vadd.f32 1.0, %v2109_v40  ;;  %2136 = vpow2.f32 %v1678_v39 }
 0x336   : > { %v2113_v44 = vpop.eup %2112  ;;  %1509 = vst.msk [vmem:[%s2548_s5 + $0x80] sm:$0xff] %vm1492_vm1, %v2111_v42  ;;  %2138 = vrcp.f32 %v1418_v41 }
 0x337   : > { %v2115_v10 = vpop.eup %2114  ;;  %1510 = vst.msk [vmem:[%s2548_s5 + $0x88] sm:$0xff] %vm1492_vm1, %v2113_v44  ;;  %2140 = vrcp.f32 %v1419_v43 }
 0x338   : > { %v2117_v45 = vpop.eup %2116  ;;  %v1420_v46 = vadd.f32 1.0, %v2115_v10 }
 0x339   : > { %v2119_v47 = vpop.eup %2118  ;;  %v1421_v48 = vadd.f32 1.0, %v2117_v45 }
 0x33a   : > { %v2121_v49 = vpop.eup %2120  ;;  %2142 = vrcp.f32 %v1420_v46  ;;  %v1422_v50 = vadd.f32 1.0, %v2119_v47 }
 0x33b   : > { %v2123_v51 = vpop.eup %2122  ;;  %1511 = vst.msk [vmem:[%s2548_s5 + $0x90] sm:$0xff] %vm1492_vm1, %v2121_v49  ;;  %2144 = vrcp.f32 %v1421_v48 }
 0x33c   : > { %v2125_v52 = vpop.eup %2124  ;;  %2146 = vrcp.f32 %v1422_v50  ;;  %v1423_v53 = vadd.f32 1.0, %v2123_v51 }
 0x33d   : > { %v2127_v54 = vpop.eup %2126  ;;  %1512 = vst.msk [vmem:[%s2548_s5 + $0x98] sm:$0xff] %vm1492_vm1, %v2125_v52 }
 0x33e   : > { %v2129_v55 = vpop.eup %2128  ;;  %2148 = vrcp.f32 %v1423_v53  ;;  %v1424_v56 = vadd.f32 1.0, %v2127_v54 }
 0x33f   : > { %v2131_v57 = vpop.eup %2130  ;;  %1513 = vst.msk [vmem:[%s2548_s5 + $0xa0] sm:$0xff] %vm1492_vm1, %v2129_v55 }
 0x340   : > { %v2133_v58 = vpop.eup %2132  ;;  %2150 = vrcp.f32 %v1424_v56  ;;  %v1425_v59 = vadd.f32 1.0, %v2131_v57 }
 0x341   : > { %v2135_v60 = vpop.eup %2134  ;;  %1514 = vst.msk [vmem:[%s2548_s5 + $0xa8] sm:$0xff] %vm1492_vm1, %v2133_v58 }
 0x342   : > { %v2137_v61 = vpop.eup %2136  ;;  %2152 = vrcp.f32 %v1425_v59  ;;  %v1426_v63 = vadd.f32 1.0, %v2135_v60 }
 0x343   : > { %v2139_v0 = vpop.eup %2138  ;;  %v1427_v1 = vadd.f32 1.0, %v2137_v61 }
 0x344   : > { %v2141_v2 = vpop.eup %2140  ;;  %1515 = vst.msk [vmem:[%s2548_s5 + $0xb0] sm:$0xff] %vm1492_vm1, %v2139_v0  ;;  %2154 = vrcp.f32 %v1426_v63 }
 0x345   : > { %1516 = vst.msk [vmem:[%s2548_s5 + $0xb8] sm:$0xff] %vm1492_vm1, %v2141_v2  ;;  %2156 = vrcp.f32 %v1427_v1 }
 0x347   : > { %v2143_v3 = vpop.eup %2142 }
 0x348   : > { %v2145_v4 = vpop.eup %2144  ;;  %1517 = vst.msk [vmem:[%s2548_s5 + $0xc0] sm:$0xff] %vm1492_vm1, %v2143_v3 }
 0x349   : > { %v2147_v5 = vpop.eup %2146  ;;  %1518 = vst.msk [vmem:[%s2548_s5 + $0xc8] sm:$0xff] %vm1492_vm1, %v2145_v4 }
 0x34a   : > { %1519 = vst.msk [vmem:[%s2548_s5 + $0xd0] sm:$0xff] %vm1492_vm1, %v2147_v5 }
 0x34b   : > { %v2149_v7 = vpop.eup %2148 }
 0x34c   : > { %1520 = vst.msk [vmem:[%s2548_s5 + $0xd8] sm:$0xff] %vm1492_vm1, %v2149_v7 }
 0x34d   : > { %v2151_v8 = vpop.eup %2150 }
 0x34e   : > { %1521 = vst.msk [vmem:[%s2548_s5 + $0xe0] sm:$0xff] %vm1492_vm1, %v2151_v8 }
 0x34f   : > { %v2153_v34 = vpop.eup %2152 }
 0x350   : > { %1522 = vst.msk [vmem:[%s2548_s5 + $0xe8] sm:$0xff] %vm1492_vm1, %v2153_v34 }
 0x351   : > { %v2155_v6 = vpop.eup %2154 }
 0x352   : > { %v2157_v11 = vpop.eup %2156  ;;  %1523 = vst.msk [vmem:[%s2548_s5 + $0xf0] sm:$0xff] %vm1492_vm1, %v2155_v6 }
 0x353   : > { %1524 = vst.msk [vmem:[%s2548_s5 + $0xf8] sm:$0xff] %vm1492_vm1, %v2157_v11 }
 0x354 PF: > { %s14_s15 = sadd.s32 1, %s2164_s15  }
 0x355   : > { %p11_p4 = scmp.ge.s32.totalorder %s14_s15, 4  }
 0x357   :  { %13 = sbr.rel (!%p11_p4) target bundleno = 1 (0x1), region = 71 }

</bundles_post_ra>
